<compile_context>
chip_gen: v5e
topology: v5e:2x2
jax: 0.10.0
libtpu: 0.0.40
codegen_flags: <defaults>
</compile_context>

<pallas_src>
import jax
import jax.numpy as jnp
from jax.experimental import pallas as pl
from jax.experimental.pallas import tpu as pltpu

LEAKY = 0.5  # TODO(synk): stand-in for args.leaky (runtime config in the original).


def _leaky_relu(x):
    return jnp.maximum(LEAKY * x, x)


def _round_up(x, m):
    return ((x + m - 1) // m) * m


# --------------------------------------------------------------------------- #
# Phase 1: lat4 = FC-residual-chain(LeakyReLU(adj^T @ lats))
#   grid over N tiles (reduction axis, "arbitrary"); f32 accumulator scratch;
#   FC chain runs once in the last-step epilogue.
# --------------------------------------------------------------------------- #
def _phase1_kernel(adjT_ref, lats_ref, wT_ref, lat4_ref, acc_ref):
    step = pl.program_id(0)

    @pl.when(step == 0)
    def _init():
        acc_ref[...] = jnp.zeros_like(acc_ref)

    # Accumulate adj^T @ lats for this N tile (bf16 operands, f32 accumulation).
    acc_ref[...] += jnp.dot(adjT_ref[...], lats_ref[...],
                            preferred_element_type=jnp.float32)

    @pl.when(step == pl.num_programs(0) - 1)
    def _epilogue():
        lat1 = _leaky_relu(acc_ref[...])            # (H_pad, D_pad) f32

        def fc_residual(wT, lat):
            # transpose(LeakyRelu(lat^T @ W)) + lat == LeakyRelu(W^T @ lat) + lat
            fc = jnp.dot(wT, lat.astype(wT.dtype),
                         preferred_element_type=jnp.float32)
            return _leaky_relu(fc) + lat            # elementwise kept in f32

        lat2 = fc_residual(wT_ref[0], lat1)
        lat3 = fc_residual(wT_ref[1], lat2)
        lat4 = fc_residual(wT_ref[2], lat3)
        lat4_ref[...] = lat4.astype(lat4_ref.dtype)


# --------------------------------------------------------------------------- #
# Phase 2: out = LeakyReLU(adj @ lat4), grid over N tiles ("parallel").
# --------------------------------------------------------------------------- #
def _phase2_kernel(adj_ref, lat4_ref, out_ref):
    out_ref[...] = _leaky_relu(
        jnp.dot(adj_ref[...], lat4_ref[...],
                preferred_element_type=jnp.float32)).astype(out_ref.dtype)


def hyper_propagate(lats, adj, w1, w2, w3, *, block_n=512,
                    matmul_dtype=jnp.bfloat16):
    N, D = lats.shape
    N2, H = adj.shape
    assert N2 == N
    for w in (w1, w2, w3):
        assert w.shape == (H, H)

    out_dtype = lats.dtype

    # Lane-dense padding (exact: padded rows/cols contribute zeros and the
    # padded output region is sliced away).
    H_pad = _round_up(H, 128)
    D_pad = _round_up(D, 128)
    bn = min(block_n, _round_up(N, 128))
    N_pad = _round_up(N, bn)
    n_tiles = N_pad // bn

    adj_p = jnp.pad(adj, ((0, N_pad - N), (0, H_pad - H))).astype(matmul_dtype)
    adjT_p = adj_p.T                                     # (H_pad, N_pad), pre-transposed
    lats_p = jnp.pad(lats, ((0, N_pad - N), (0, D_pad - D))).astype(matmul_dtype)
    wT = jnp.stack([
        jnp.pad(w, ((0, H_pad - H), (0, H_pad - H))).T.astype(matmul_dtype)
        for w in (w1, w2, w3)])                          # (3, H_pad, H_pad)

    mm_bytes = jnp.dtype(matmul_dtype).itemsize
    out_bytes = jnp.dtype(out_dtype).itemsize

    # ---- phase 1 ----------------------------------------------------------- #
    p1_vmem = int(2 * (H_pad * bn + bn * D_pad + 3 * H_pad * H_pad
                       + H_pad * D_pad) * mm_bytes + H_pad * D_pad * 4)
    lat4 = pl.pallas_call(
        _phase1_kernel,
        out_shape=jax.ShapeDtypeStruct((H_pad, D_pad), matmul_dtype),
        grid=(n_tiles,),
        in_specs=[
            pl.BlockSpec((H_pad, bn), lambda i: (0, i)),          # adj^T tile
            pl.BlockSpec((bn, D_pad), lambda i: (i, 0)),          # lats tile
            pl.BlockSpec((3, H_pad, H_pad), lambda i: (0, 0, 0)), # W^T (resident)
        ],
        out_specs=pl.BlockSpec((H_pad, D_pad), lambda i: (0, 0)),
        scratch_shapes=[pltpu.VMEM((H_pad, D_pad), jnp.float32)],
        compiler_params=pltpu.CompilerParams(
            dimension_semantics=("arbitrary",),
            vmem_limit_bytes=max(16 << 20, 2 * p1_vmem)),
    )(adjT_p, lats_p, wT)

    # ---- phase 2 ----------------------------------------------------------- #
    p2_vmem = int(2 * (bn * H_pad * mm_bytes + H_pad * D_pad * mm_bytes
                       + bn * D_pad * out_bytes))
    out_p = pl.pallas_call(
        _phase2_kernel,
        out_shape=jax.ShapeDtypeStruct((N_pad, D_pad), out_dtype),
        grid=(n_tiles,),
        in_specs=[
            pl.BlockSpec((bn, H_pad), lambda i: (i, 0)),          # adj tile
            pl.BlockSpec((H_pad, D_pad), lambda i: (0, 0)),       # lat4 (resident)
        ],
        out_specs=pl.BlockSpec((bn, D_pad), lambda i: (i, 0)),
        compiler_params=pltpu.CompilerParams(
            dimension_semantics=("parallel",),
            vmem_limit_bytes=max(16 << 20, 2 * p2_vmem)),
    )(adj_p, lat4)

    return out_p[:N, :D]


# --------------------------------------------------------------------------- #
# References
# --------------------------------------------------------------------------- #
def _reference_f32(lats, adj, w1, w2, w3):
    lat1 = _leaky_relu(adj.T @ lats)
    lat2 = _leaky_relu(lat1.T @ w1).T + lat1
    lat3 = _leaky_relu(lat2.T @ w2).T + lat2
    lat4 = _leaky_relu(lat3.T @ w3).T + lat3
    return _leaky_relu(adj @ lat4)


def _reference_quantized(lats, adj, w1, w2, w3, dtype=jnp.bfloat16):
    """Same math with the kernel's bf16-operand / f32-accumulation choices."""
    adj_b = adj.astype(dtype)
    lats_b = lats.astype(dtype)
    lat1 = _leaky_relu(jnp.dot(adj_b.T, lats_b,
                               preferred_element_type=jnp.float32))

    def fc_res(w, lat):
        fc = jnp.dot(w.astype(dtype).T, lat.astype(dtype),
                     preferred_element_type=jnp.float32)
        return _leaky_relu(fc) + lat

    lat2 = fc_res(w1, lat1)
    lat3 = fc_res(w2, lat2)
    lat4 = fc_res(w3, lat3).astype(dtype)
    return _leaky_relu(jnp.dot(adj_b, lat4,
                               preferred_element_type=jnp.float32))


def _xavier_normal(key, fan_in, fan_out, dtype=jnp.float32):
    std = (2.0 / (fan_in + fan_out)) ** 0.5
    return std * jax.random.normal(key, (fan_in, fan_out), dtype=dtype)


if __name__ == "__main__":
    # Small shapes consistent with the module: inputdim == hyperNum == H.
    N, H, D = 16, 32, 32
    key = jax.random.PRNGKey(0)
    k_lats, k_adj, k_w1, k_w2, k_w3 = jax.random.split(key, 5)

    lats = jax.random.normal(k_lats, (N, D), dtype=jnp.float32)
    adj = jax.random.normal(k_adj, (N, H), dtype=jnp.float32)
    w1 = _xavier_normal(k_w1, H, H)
    w2 = _xavier_normal(k_w2, H, H)
    w3 = _xavier_normal(k_w3, H, H)

    out = jax.block_until_ready(hyper_propagate(lats, adj, w1, w2, w3))
    assert out.shape == (N, D) and out.dtype == lats.dtype

    # Structural correctness: identical quantization choices -> tight match.
    ref_q = _reference_quantized(lats, adj, w1, w2, w3)
    assert jnp.allclose(out, ref_q, rtol=1e-3, atol=1e-3), "mismatch vs bf16 reference"

    # Overall fidelity vs full-f32 PyTorch-equivalent math (bf16 operands ->
    # loose, norm-based tolerance).
    ref = _reference_f32(lats, adj, w1, w2, w3)
    rel_err = jnp.linalg.norm(out - ref) / jnp.linalg.norm(ref)
    assert rel_err < 2e-2, f"relative error too large: {rel_err}"

    print("KERNEL_OK")
</pallas_src>

<mosaic_0001>
module attributes {stable_mosaic.version = 11 : i64} {
  func.func @_phase1_kernel(%arg0: i32, %arg1: memref<128x128xbf16, #tpu.memory_space<vmem>>, %arg2: memref<128x128xbf16, #tpu.memory_space<vmem>>, %arg3: memref<3x128x128xbf16, #tpu.memory_space<vmem>>, %arg4: memref<128x128xbf16, #tpu.memory_space<vmem>>, %arg5: memref<128x128xf32, #tpu.memory_space<vmem>>) attributes {dimension_semantics = [#tpu.dimension_semantics<arbitrary>], iteration_bounds = array<i64: 1>, scalar_prefetch = 0 : i64, scratch_operands = 1 : i64, tpu.core_type = #tpu.core_type<tc>, window_params = [{transform_indices = @transform_0, window_bounds = array<i64: 128, 128>}, {transform_indices = @transform_1, window_bounds = array<i64: 128, 128>}, {pipeline_mode = #tpu.pipeline_mode<synchronous>, transform_indices = @transform_2, window_bounds = array<i64: 3, 128, 128>}, {pipeline_mode = #tpu.pipeline_mode<synchronous>, transform_indices = @transform_3, window_bounds = array<i64: 128, 128>}]} {
    %c0_i32 = arith.constant 0 : i32
    %0 = arith.cmpi eq, %arg0, %c0_i32 : i32
    %1 = arith.extui %0 : i1 to i32
    %c0_i32_0 = arith.constant 0 : i32
    %2 = arith.cmpi ne, %1, %c0_i32_0 : i32
    scf.if %2 {
      %cst_10 = arith.constant 0.000000e+00 : f32
      %12 = vector.broadcast %cst_10 : f32 to vector<128x128xf32>
      %c0_11 = arith.constant 0 : index
      %c0_12 = arith.constant 0 : index
      %13 = vector.load %arg5[%c0_11, %c0_12] : memref<128x128xf32, #tpu.memory_space<vmem>>, vector<128x128xf32>
      tpu.vector_store %arg5[%c0_11, %c0_12], %12 {strides = array<i32>} : memref<128x128xf32, #tpu.memory_space<vmem>>, vector<128x128xf32>,
    } else {
    }
    %c0 = arith.constant 0 : index
    %c0_1 = arith.constant 0 : index
    %3 = vector.load %arg5[%c0, %c0_1] : memref<128x128xf32, #tpu.memory_space<vmem>>, vector<128x128xf32>
    %c0_2 = arith.constant 0 : index
    %c0_3 = arith.constant 0 : index
    %4 = vector.load %arg1[%c0_2, %c0_3] : memref<128x128xbf16, #tpu.memory_space<vmem>>, vector<128x128xbf16>
    %c0_4 = arith.constant 0 : index
    %c0_5 = arith.constant 0 : index
    %5 = vector.load %arg2[%c0_4, %c0_5] : memref<128x128xbf16, #tpu.memory_space<vmem>>, vector<128x128xbf16>
    %cst = arith.constant dense<0.000000e+00> : vector<128x128xf32>
    %6 = tpu.matmul %4, %5, %cst {dimension_numbers = #tpu.dot_dimension_numbers<[1], [0], [0], [1], [0, 0, 1, 1], [], []>} : vector<128x128xbf16>, vector<128x128xbf16>, vector<128x128xf32> -> vector<128x128xf32>
    %7 = arith.addf %3, %6 : vector<128x128xf32>
    %c0_6 = arith.constant 0 : index
    %c0_7 = arith.constant 0 : index
    %8 = vector.load %arg5[%c0_6, %c0_7] : memref<128x128xf32, #tpu.memory_space<vmem>>, vector<128x128xf32>
    tpu.vector_store %arg5[%c0_6, %c0_7], %7 {strides = array<i32>} : memref<128x128xf32, #tpu.memory_space<vmem>>, vector<128x128xf32>,
    %c0_i32_8 = arith.constant 0 : i32
    %9 = arith.cmpi eq, %arg0, %c0_i32_8 : i32
    %10 = arith.extui %9 : i1 to i32
    %c0_i32_9 = arith.constant 0 : i32
    %11 = arith.cmpi ne, %10, %c0_i32_9 : i32
    scf.if %11 {
      %c0_10 = arith.constant 0 : index
      %c0_11 = arith.constant 0 : index
      %12 = vector.load %arg5[%c0_10, %c0_11] : memref<128x128xf32, #tpu.memory_space<vmem>>, vector<128x128xf32>
      %cst_12 = arith.constant 5.000000e-01 : f32
      %13 = vector.broadcast %cst_12 : f32 to vector<128x128xf32>
      %14 = arith.mulf %13, %12 : vector<128x128xf32>
      %15 = arith.maximumf %14, %12 : vector<128x128xf32>
      %c0_13 = arith.constant 0 : index
      %c0_14 = arith.constant 0 : index
      %c0_15 = arith.constant 0 : index
      %16 = vector.load %arg3[%c0_13, %c0_14, %c0_15] : memref<3x128x128xbf16, #tpu.memory_space<vmem>>, vector<1x128x128xbf16>
      %17 = vector.shape_cast %16 : vector<1x128x128xbf16> to vector<128x128xbf16>
      %18 = arith.truncf %15 : vector<128x128xf32> to vector<128x128xbf16>
      %cst_16 = arith.constant dense<0.000000e+00> : vector<128x128xf32>
      %19 = tpu.matmul %17, %18, %cst_16 {dimension_numbers = #tpu.dot_dimension_numbers<[1], [0], [0], [1], [0, 0, 1, 1], [], []>} : vector<128x128xbf16>, vector<128x128xbf16>, vector<128x128xf32> -> vector<128x128xf32>
      %cst_17 = arith.constant 5.000000e-01 : f32
      %20 = vector.broadcast %cst_17 : f32 to vector<128x128xf32>
      %21 = arith.mulf %20, %19 : vector<128x128xf32>
      %22 = arith.maximumf %21, %19 : vector<128x128xf32>
      %23 = arith.addf %22, %15 : vector<128x128xf32>
      %c1 = arith.constant 1 : index
      %c0_18 = arith.constant 0 : index
      %c0_19 = arith.constant 0 : index
      %24 = vector.load %arg3[%c1, %c0_18, %c0_19] : memref<3x128x128xbf16, #tpu.memory_space<vmem>>, vector<1x128x128xbf16>
      %25 = vector.shape_cast %24 : vector<1x128x128xbf16> to vector<128x128xbf16>
      %26 = arith.truncf %23 : vector<128x128xf32> to vector<128x128xbf16>
      %cst_20 = arith.constant dense<0.000000e+00> : vector<128x128xf32>
      %27 = tpu.matmul %25, %26, %cst_20 {dimension_numbers = #tpu.dot_dimension_numbers<[1], [0], [0], [1], [0, 0, 1, 1], [], []>} : vector<128x128xbf16>, vector<128x128xbf16>, vector<128x128xf32> -> vector<128x128xf32>
      %cst_21 = arith.constant 5.000000e-01 : f32
      %28 = vector.broadcast %cst_21 : f32 to vector<128x128xf32>
      %29 = arith.mulf %28, %27 : vector<128x128xf32>
      %30 = arith.maximumf %29, %27 : vector<128x128xf32>
      %31 = arith.addf %30, %23 : vector<128x128xf32>
      %c2 = arith.constant 2 : index
      %c0_22 = arith.constant 0 : index
      %c0_23 = arith.constant 0 : index
      %32 = vector.load %arg3[%c2, %c0_22, %c0_23] : memref<3x128x128xbf16, #tpu.memory_space<vmem>>, vector<1x128x128xbf16>
      %33 = vector.shape_cast %32 : vector<1x128x128xbf16> to vector<128x128xbf16>
      %34 = arith.truncf %31 : vector<128x128xf32> to vector<128x128xbf16>
      %cst_24 = arith.constant dense<0.000000e+00> : vector<128x128xf32>
      %35 = tpu.matmul %33, %34, %cst_24 {dimension_numbers = #tpu.dot_dimension_numbers<[1], [0], [0], [1], [0, 0, 1, 1], [], []>} : vector<128x128xbf16>, vector<128x128xbf16>, vector<128x128xf32> -> vector<128x128xf32>
      %cst_25 = arith.constant 5.000000e-01 : f32
      %36 = vector.broadcast %cst_25 : f32 to vector<128x128xf32>
      %37 = arith.mulf %36, %35 : vector<128x128xf32>
      %38 = arith.maximumf %37, %35 : vector<128x128xf32>
      %39 = arith.addf %38, %31 : vector<128x128xf32>
      %40 = arith.truncf %39 : vector<128x128xf32> to vector<128x128xbf16>
      %c0_26 = arith.constant 0 : index
      %c0_27 = arith.constant 0 : index
      %41 = vector.load %arg4[%c0_26, %c0_27] : memref<128x128xbf16, #tpu.memory_space<vmem>>, vector<128x128xbf16>
      tpu.vector_store %arg4[%c0_26, %c0_27], %40 {strides = array<i32>} : memref<128x128xbf16, #tpu.memory_space<vmem>>, vector<128x128xbf16>,
    } else {
    }
    return
  }
  func.func @transform_0(%arg0: i32) -> (i32, i32) {
    %c0_i32 = arith.constant 0 : i32
    %c0_i32_0 = arith.constant 0 : i32
    return %c0_i32, %arg0 : i32, i32
  }
  func.func @transform_1(%arg0: i32) -> (i32, i32) {
    %c0_i32 = arith.constant 0 : i32
    %c0_i32_0 = arith.constant 0 : i32
    return %arg0, %c0_i32 : i32, i32
  }
  func.func @transform_2(%arg0: i32) -> (i32, i32, i32) {
    %c0_i32 = arith.constant 0 : i32
    %c0_i32_0 = arith.constant 0 : i32
    %c0_i32_1 = arith.constant 0 : i32
    %c0_i32_2 = arith.constant 0 : i32
    return %c0_i32, %c0_i32_0, %c0_i32_1 : i32, i32, i32
  }
  func.func @transform_3(%arg0: i32) -> (i32, i32) {
    %c0_i32 = arith.constant 0 : i32
    %c0_i32_0 = arith.constant 0 : i32
    %c0_i32_1 = arith.constant 0 : i32
    return %c0_i32, %c0_i32_0 : i32, i32
  }
}

</mosaic_0001>

<bundles_post_ra>
// kernel: tpu_custom_call.1
= control target key start
LH: loop header
LB: loop body
LE: loop exit
PB: predicated region body
PF: predicated region fallthrough
CT: control target
= control target key end

     0   :  { %8 = vsyncpa [#allocation4], 0  ;;  %s1532_s0 = inlined_call_operand.hbm [shape: bf16[128,128], index: 0, kind: input, shape index: {}]   ;;  %s1533_s1 = inlined_call_operand.hbm [shape: bf16[128,128], index: 1, kind: input, shape index: {}]   ;;  %s1534_s2 = inlined_call_operand.hbm [shape: bf16[3,128,128], index: 2, kind: input, shape index: {}]   ;;  %s1535_s3 = inlined_call_operand.hbm [shape: bf16[128,128], index: 3, kind: output, shape index: {}]  }
   0x1   :  { %9 = vsyncpa [#allocation7], 0 }
   0x2   :  { %10 = vsyncpa [#allocation5], 0  ;;  %s28_s14 = sshll.u32 %s1533_s1, 4  ;;  %s1274_s15 = smov [#allocation6]   ;;  %s29_s14 = int_to_ptr.hbm [resolvable:$true] %s28_s14 }
   0x3   :  { %s30_s16 = sshll.u32 %s1274_s15, 4  ;;  %s15_s19 = sshll.u32 %s1532_s0, 4  ;;  %s31_s16 = int_to_ptr.vmem [resolvable:$true] %s30_s16  ;;  %s16_s19 = int_to_ptr.hbm [resolvable:$true] %s15_s19 }
   0x4   :  { %s1275_s20 = smov 64   ;;  %s1276_s21 = smov 4  }
   0x5   :  { %36 = dma.hbm_to_vmem [thread:$0]  %s29_s14, 1024, %s31_s16, [#allocation7], %s1275_s20, %s1275_s20, %s1276_s21  }
   0x6   :  { %s1277_s22 = smov [#allocation3]   ;;  %s41_s1 = sshll.u32 %s1534_s2, 4  ;;  %s42_s1 = int_to_ptr.hbm [resolvable:$true] %s41_s1 }
   0x7   :  { %s17_s23 = sshll.u32 %s1277_s22, 4  ;;  %s1278_s0 = smov [#allocation8]   ;;  %s18_s23 = int_to_ptr.vmem [resolvable:$true] %s17_s23 }
   0x8   :  { %23 = dma.hbm_to_vmem [thread:$0]  %s16_s19, 1024, %s18_s23, [#allocation4], %s1275_s20, %s1275_s20, %s1276_s21  }
   0x9   :  { %s43_s26 = sshll.u32 %s1278_s0, 4  ;;  %s44_s26 = int_to_ptr.vmem [resolvable:$true] %s43_s26 }
   0xa   :  { %49 = dma.hbm_to_vmem [thread:$0]  %s42_s1, 3072, %s44_s26, [#allocation7], %s1275_s20, %s1275_s20, %s1276_s21  }
   0xb   :  { %1268 = dma.done.wait [#allocation4], 1024  }
   0xc   :  { %1269 = vsyncadd [#allocation4], 4294966272 }
   0xd   :  { %1270 = dma.done.wait [#allocation7], 4096  }
   0xe   :  { %1271 = vsyncadd [#allocation7], 4294963200  ;;  %v1094_v0 = vld [vmem:[#allocation6 + $0x38] sm:$0xff]  ;;  %v1093_v1 = vld [vmem:[#allocation6 + $0x30] sm:$0xff]  ;;  %s1279_s2 = smov [#allocation9]   ;;  %s905_s30 = sshll.u32 %s1535_s3, 4  ;;  %s906_s30 = int_to_ptr.hbm [resolvable:$true] %s905_s30 }
   0xf   :  { %226 = vmatpush.bf16.msra.mxu0 %v1094_v0  ;;  %v1092_v2 = vld [vmem:[#allocation6 + $0x28] sm:$0xff]  ;;  %v1091_v3 = vld [vmem:[#allocation6 + $0x20] sm:$0xff]  ;;  %v1090_v4 = vld [vmem:[#allocation6 + $0x18] sm:$0xff]  ;;  %s903_s27 = sshll.u32 %s1279_s2, 4  ;;  %s904_s27 = int_to_ptr.vmem [resolvable:$true] %s903_s27 }
  0x10   :  { %v1089_v5 = vld [vmem:[#allocation6 + $0x10] sm:$0xff]  ;;  %v1088_v6 = vld [vmem:[#allocation6 + $0x8] sm:$0xff]  ;;  %v1087_v7 = vld [vmem:[#allocation6] sm:$0xff] }
  0x11   :  { %v1079_v8 = vld [vmem:[#allocation3] sm:$0xff]  ;;  %v1080_v9 = vld [vmem:[#allocation3 + $0x8] sm:$0xff]  ;;  %v1081_v10 = vld [vmem:[#allocation3 + $0x10] sm:$0xff] }
  0x12   :  { %v1082_v11 = vld [vmem:[#allocation3 + $0x18] sm:$0xff]  ;;  %v1083_v12 = vld [vmem:[#allocation3 + $0x20] sm:$0xff]  ;;  %v1084_v13 = vld [vmem:[#allocation3 + $0x28] sm:$0xff] }
  0x13   :  { %227 = vmatpush.bf16.msra.mxu0 %v1093_v1  ;;  %v1085_v14 = vld [vmem:[#allocation3 + $0x30] sm:$0xff]  ;;  %v1086_v15 = vld [vmem:[#allocation3 + $0x38] sm:$0xff] }
  0x17   :  { %228 = vmatpush.bf16.msra.mxu0 %v1092_v2 }
  0x1b   :  { %229 = vmatpush.bf16.msra.mxu0 %v1091_v3 }
  0x1f   :  { %230 = vmatpush.bf16.msra.mxu0 %v1090_v4 }
  0x23   :  { %231 = vmatpush.bf16.msra.mxu0 %v1089_v5 }
  0x27   :  { %232 = vmatpush.bf16.msra.mxu0 %v1088_v6 }
  0x2b   :  { %233 = vmatpush.bf16.msra.mxu0 %v1087_v7 }
  0x2e   :  { %234 = vmatmul.bf16.vlgmr.msra.gmra.mxu0 %v1079_v8  ;;  %v1095_v8 = vld [vmem:[#allocation8] sm:$0xff] }
  0x3e   :  { %239 = vmatmul.bf16.gmra.mxu0 %v1080_v9  ;;  %v1096_v9 = vld [vmem:[#allocation8 + $0x8] sm:$0xff] }
  0x4e   :  { %244 = vmatmul.bf16.gmra.mxu0 %v1081_v10  ;;  %v1097_v10 = vld [vmem:[#allocation8 + $0x10] sm:$0xff] }
  0x5e   :  { %249 = vmatmul.bf16.gmra.mxu0 %v1082_v11  ;;  %v1098_v11 = vld [vmem:[#allocation8 + $0x18] sm:$0xff] }
  0x6e   :  { %254 = vmatmul.bf16.gmra.mxu0 %v1083_v12  ;;  %v1099_v12 = vld [vmem:[#allocation8 + $0x20] sm:$0xff] }
  0x7e   :  { %259 = vmatmul.bf16.gmra.mxu0 %v1084_v13  ;;  %v1100_v13 = vld [vmem:[#allocation8 + $0x28] sm:$0xff] }
  0x8e   :  { %264 = vmatmul.bf16.gmra.mxu0 %v1085_v14  ;;  %v1101_v14 = vld [vmem:[#allocation8 + $0x30] sm:$0xff] }
  0x9e   :  { %269 = vmatmul.bf16.gmra.mxu0 %v1086_v15  ;;  %v1102_v15 = vld [vmem:[#allocation8 + $0x38] sm:$0xff] }
  0xab   :  { %v235_v16 = vpop.f32.mrf.mxu0 }
  0xac   :  { %v326_v2 = vmul.f32 0.5, %v235_v16 }
  0xae   :  { %v1362_v6 = vmax.f32 %v326_v2, %v235_v16 }
  0xb3   :  { %v237_v17 = vpop.f32.mrf.mxu0 }
  0xb4   :  { %v327_v63 = vmul.f32 0.5, %v237_v17 }
  0xb6   :  { %v1358_v4 = vmax.f32 %v327_v63, %v237_v17 }
  0xb8   :  { %v374_v7 = vpack.c.bf16 %v1358_v4, %v1362_v6 }
  0xbb   :  { %v240_v18 = vpop.f32.mrf.mxu0 }
  0xbc   :  { %v328_v61 = vmul.f32 0.5, %v240_v18 }
  0xbe   :  { %v1356_v3 = vmax.f32 %v328_v61, %v240_v18 }
  0xc3   :  { %v242_v19 = vpop.f32.mrf.mxu0 }
  0xc4   :  { %v329_v58 = vmul.f32 0.5, %v242_v19 }
  0xc6   :  { %v1352_v0 = vmax.f32 %v329_v58, %v242_v19 }
  0xc8   :  { %v375_v5 = vpack.c.bf16 %v1352_v0, %v1356_v3 }
  0xcb   :  { %v245_v20 = vpop.f32.mrf.mxu0 }
  0xcc   :  { %v330_v56 = vmul.f32 0.5, %v245_v20 }
  0xce   :  { %v1350_v62 = vmax.f32 %v330_v56, %v245_v20 }
  0xd3   :  { %v247_v21 = vpop.f32.mrf.mxu0 }
  0xd4   :  { %v331_v53 = vmul.f32 0.5, %v247_v21 }
  0xd6   :  { %v1346_v59 = vmax.f32 %v331_v53, %v247_v21 }
  0xd8   :  { %v376_v1 = vpack.c.bf16 %v1346_v59, %v1350_v62 }
  0xdb   :  { %v250_v22 = vpop.f32.mrf.mxu0 }
  0xdc   :  { %v332_v51 = vmul.f32 0.5, %v250_v22 }
  0xde   :  { %v1344_v57 = vmax.f32 %v332_v51, %v250_v22 }
  0xe3   :  { %v252_v23 = vpop.f32.mrf.mxu0 }
  0xe4   :  { %v333_v48 = vmul.f32 0.5, %v252_v23 }
  0xe6   :  { %v1340_v54 = vmax.f32 %v333_v48, %v252_v23 }
  0xe8   :  { %v377_v60 = vpack.c.bf16 %v1340_v54, %v1344_v57 }
  0xeb   :  { %v255_v24 = vpop.f32.mrf.mxu0 }
  0xec   :  { %v334_v46 = vmul.f32 0.5, %v255_v24 }
  0xee   :  { %v1338_v52 = vmax.f32 %v334_v46, %v255_v24 }
  0xf3   :  { %v257_v25 = vpop.f32.mrf.mxu0 }
  0xf4   :  { %v335_v43 = vmul.f32 0.5, %v257_v25 }
  0xf6   :  { %v1334_v49 = vmax.f32 %v335_v43, %v257_v25 }
  0xf8   :  { %v378_v55 = vpack.c.bf16 %v1334_v49, %v1338_v52 }
  0xfb   :  { %v260_v26 = vpop.f32.mrf.mxu0 }
  0xfc   :  { %v336_v41 = vmul.f32 0.5, %v260_v26 }
  0xfe   :  { %v1332_v47 = vmax.f32 %v336_v41, %v260_v26 }
 0x103   :  { %v262_v27 = vpop.f32.mrf.mxu0 }
 0x104   :  { %v337_v38 = vmul.f32 0.5, %v262_v27 }
 0x106   :  { %v1328_v44 = vmax.f32 %v337_v38, %v262_v27 }
 0x108   :  { %v379_v50 = vpack.c.bf16 %v1328_v44, %v1332_v47 }
 0x10b   :  { %v265_v28 = vpop.f32.mrf.mxu0 }
 0x10c   :  { %v338_v35 = vmul.f32 0.5, %v265_v28 }
 0x10e   :  { %v1326_v42 = vmax.f32 %v338_v35, %v265_v28 }
 0x113   :  { %v267_v29 = vpop.f32.mrf.mxu0 }
 0x114   :  { %v339_v33 = vmul.f32 0.5, %v267_v29 }
 0x116   :  { %v1322_v39 = vmax.f32 %v339_v33, %v267_v29 }
 0x118   :  { %v380_v45 = vpack.c.bf16 %v1322_v39, %v1326_v42 }
 0x11b   :  { %v270_v30 = vpop.f32.mrf.mxu0 }
 0x11c   :  { %v340_v31 = vmul.f32 0.5, %v270_v30 }
 0x11e   :  { %v1318_v36 = vmax.f32 %v340_v31, %v270_v30 }
 0x123   :  { %v272_v32 = vpop.f32.mrf.mxu0 }
 0x124   :  { %v341_v34 = vmul.f32 0.5, %v272_v32 }
 0x126   :  { %v1320_v37 = vmax.f32 %v341_v34, %v272_v32 }
 0x128   :  { %v381_v40 = vpack.c.bf16 %v1320_v37, %v1318_v36 }
 0x12a   :  { %430 = vmatpush.bf16.msra.mxu1 %v381_v40 }
 0x12e   :  { %431 = vmatpush.bf16.msra.mxu1 %v380_v45 }
 0x132   :  { %432 = vmatpush.bf16.msra.mxu1 %v379_v50 }
 0x136   :  { %433 = vmatpush.bf16.msra.mxu1 %v378_v55 }
 0x13a   :  { %434 = vmatpush.bf16.msra.mxu1 %v377_v60 }
 0x13e   :  { %435 = vmatpush.bf16.msra.mxu1 %v376_v1 }
 0x142   :  { %436 = vmatpush.bf16.msra.mxu1 %v375_v5 }
 0x146   :  { %437 = vmatpush.bf16.msra.mxu1 %v374_v7 }
 0x149   :  { %438 = vmatmul.bf16.vlgmr.msra.gmra.mxu1 %v1095_v8 }
 0x159   :  { %443 = vmatmul.bf16.gmra.mxu1 %v1096_v9 }
 0x169   :  { %448 = vmatmul.bf16.gmra.mxu1 %v1097_v10 }
 0x179   :  { %453 = vmatmul.bf16.gmra.mxu1 %v1098_v11 }
 0x189   :  { %458 = vmatmul.bf16.gmra.mxu1 %v1099_v12 }
 0x199   :  { %463 = vmatmul.bf16.gmra.mxu1 %v1100_v13 }
 0x1a9   :  { %468 = vmatmul.bf16.gmra.mxu1 %v1101_v14 }
 0x1b9   :  { %473 = vmatmul.bf16.gmra.mxu1 %v1102_v15 }
 0x1c6   :  { %v1366_v16 = vpop.f32.mrf.mxu1 }
 0x1ce   :  { %v1368_v17 = vpop.f32.mrf.mxu1 }
 0x1d6   :  { %v1370_v18 = vpop.f32.mrf.mxu1 }
 0x1d7   :  { %v481_v15 = vmul.f32 0.5, %v1370_v18 }
 0x1de   :  { %v1372_v19 = vpop.f32.mrf.mxu1 }
 0x1df   :  { %v482_v12 = vmul.f32 0.5, %v1372_v19 }
 0x1e6   :  { %v1374_v20 = vpop.f32.mrf.mxu1 }
 0x1e7   :  { %v483_v10 = vmul.f32 0.5, %v1374_v20 }
 0x1ee   :  { %v451_v21 = vpop.f32.mrf.mxu1 }
 0x1ef   :  { %v484_v7 = vmul.f32 0.5, %v451_v21 }
 0x1f1   :  { %v500_v13 = vmax.f32 %v484_v7, %v451_v21 }
 0x1f6   :  { %v454_v22 = vpop.f32.mrf.mxu1 }
 0x1f7   :  { %v485_v2 = vmul.f32 0.5, %v454_v22 }
 0x1f9   :  { %v501_v11 = vmax.f32 %v485_v2, %v454_v22 }
 0x1fb   :  { %v1416_v22 = vadd.f32 %v501_v11, %v1344_v57 }
 0x1fe   :  { %v456_v23 = vpop.f32.mrf.mxu1 }
 0x1ff   :  { %v486_v63 = vmul.f32 0.5, %v456_v23 }
 0x201   :  { %v502_v8 = vmax.f32 %v486_v63, %v456_v23  ;;  %v498_v23 = vmax.f32 %v482_v12, %v1372_v19 }
 0x203   :  { %v1411_v14 = vadd.f32 %v502_v8, %v1340_v54  ;;  %v479_v54 = vmul.f32 0.5, %v1366_v16  ;;  %v1434_v19 = vadd.f32 %v498_v23, %v1352_v0 }
 0x205   :  { %v547_v21 = vpack.c.bf16 %v1411_v14, %v1416_v22 }
 0x206   :  { %v459_v24 = vpop.f32.mrf.mxu1 }
 0x207   :  { %v487_v58 = vmul.f32 0.5, %v459_v24 }
 0x209   :  { %v503_v5 = vmax.f32 %v487_v58, %v459_v24  ;;  %v1423_v24 = vadd.f32 %v500_v13, %v1346_v59 }
 0x20e   :  { %v461_v25 = vpop.f32.mrf.mxu1 }
 0x20f   :  { %v488_v51 = vmul.f32 0.5, %v461_v25 }
 0x216   :  { %v464_v26 = vpop.f32.mrf.mxu1 }
 0x217   :  { %v489_v45 = vmul.f32 0.5, %v464_v26 }
 0x219   :  { %v505_v60 = vmax.f32 %v489_v45, %v464_v26 }
 0x21e   :  { %v466_v27 = vpop.f32.mrf.mxu1 }
 0x21f   :  { %v490_v40 = vmul.f32 0.5, %v466_v27 }
 0x221   :  { %v506_v53 = vmax.f32 %v490_v40, %v466_v27  ;;  %v495_v27 = vmax.f32 %v479_v54, %v1366_v16  ;;  %v1104_v16 = vld [vmem:[#allocation8 + $0x48] sm:$0xff] }
 0x223   :  { %v1393_v1 = vadd.f32 %v506_v53, %v1328_v44  ;;  %v1405_v44 = vadd.f32 %v503_v5, %v1338_v52  ;;  %v480_v52 = vmul.f32 0.5, %v1368_v17 }
 0x225   :  { %v496_v57 = vmax.f32 %v480_v52, %v1368_v17  ;;  %v1446_v17 = vadd.f32 %v495_v27, %v1362_v6  ;;  %v1110_v6 = vld [vmem:[#allocation8 + $0x78] sm:$0xff] }
 0x226   :  { %v469_v28 = vpop.f32.mrf.mxu1 }
 0x227   :  { %v491_v34 = vmul.f32 0.5, %v469_v28 }
 0x229   :  { %v507_v46 = vmax.f32 %v491_v34, %v469_v28  ;;  %v1103_v28 = vld [vmem:[#allocation8 + $0x40] sm:$0xff] }
 0x22b   :  { %v1388_v61 = vadd.f32 %v507_v46, %v1326_v42 }
 0x22e   :  { %v471_v29 = vpop.f32.mrf.mxu1 }
 0x22f   :  { %v492_v32 = vmul.f32 0.5, %v471_v29 }
 0x231   :  { %v508_v41 = vmax.f32 %v492_v32, %v471_v29  ;;  %v1106_v29 = vld [vmem:[#allocation8 + $0x58] sm:$0xff] }
 0x233   :  { %v1385_v56 = vadd.f32 %v508_v41, %v1322_v39  ;;  %v1396_v39 = vadd.f32 %v505_v60, %v1332_v47 }
 0x235   :  { %v549_v42 = vpack.c.bf16 %v1393_v1, %v1396_v39 }
 0x236   :  { %v474_v30 = vpop.f32.mrf.mxu1 }
 0x237   :  { %v493_v31 = vmul.f32 0.5, %v474_v30 }
 0x239   :  { %v509_v35 = vmax.f32 %v493_v31, %v474_v30  ;;  %v1107_v30 = vld [vmem:[#allocation8 + $0x60] sm:$0xff]  ;;  %v1109_v31 = vld [vmem:[#allocation8 + $0x70] sm:$0xff] }
 0x23b   :  { %v1377_v48 = vadd.f32 %v509_v35, %v1318_v36  ;;  %v504_v36 = vmax.f32 %v488_v51, %v461_v25  ;;  %v497_v25 = vmax.f32 %v481_v15, %v1370_v18 }
 0x23d   :  { %v1401_v9 = vadd.f32 %v504_v36, %v1334_v49  ;;  %v499_v49 = vmax.f32 %v483_v10, %v1374_v20  ;;  %v1438_v59 = vadd.f32 %v497_v25, %v1356_v3  ;;  %v1105_v3 = vld [vmem:[#allocation8 + $0x50] sm:$0xff] }
 0x23e   :  { %v476_v33 = vpop.f32.mrf.mxu1 }
 0x23f   :  { %v494_v38 = vmul.f32 0.5, %v476_v33  ;;  %v548_v47 = vpack.c.bf16 %v1401_v9, %v1405_v44  ;;  %v1428_v20 = vadd.f32 %v499_v49, %v1350_v62  ;;  %v545_v18 = vpack.c.bf16 %v1434_v19, %v1438_v59 }
 0x240   :  { %v1443_v62 = vadd.f32 %v496_v57, %v1358_v4  ;;  %v1108_v4 = vld [vmem:[#allocation8 + $0x68] sm:$0xff] }
 0x241   :  { %v510_v43 = vmax.f32 %v494_v38, %v476_v33  ;;  %v546_v26 = vpack.c.bf16 %v1423_v24, %v1428_v20 }
 0x242   :  { %v544_v0 = vpack.c.bf16 %v1443_v62, %v1446_v17 }
 0x243   :  { %v1380_v50 = vadd.f32 %v510_v43, %v1320_v37  ;;  %v550_v37 = vpack.c.bf16 %v1385_v56, %v1388_v61 }
 0x245   :  { %v551_v55 = vpack.c.bf16 %v1380_v50, %v1377_v48 }
 0x247   :  { %600 = vmatpush.bf16.msra.mxu2 %v551_v55 }
 0x24b   :  { %601 = vmatpush.bf16.msra.mxu2 %v550_v37 }
 0x24f   :  { %602 = vmatpush.bf16.msra.mxu2 %v549_v42 }
 0x253   :  { %603 = vmatpush.bf16.msra.mxu2 %v548_v47 }
 0x257   :  { %604 = vmatpush.bf16.msra.mxu2 %v547_v21 }
 0x25b   :  { %605 = vmatpush.bf16.msra.mxu2 %v546_v26 }
 0x25f   :  { %606 = vmatpush.bf16.msra.mxu2 %v545_v18 }
 0x263   :  { %607 = vmatpush.bf16.msra.mxu2 %v544_v0 }
 0x266   :  { %608 = vmatmul.bf16.vlgmr.msra.gmra.mxu2 %v1103_v28 }
 0x276   :  { %613 = vmatmul.bf16.gmra.mxu2 %v1104_v16 }
 0x286   :  { %618 = vmatmul.bf16.gmra.mxu2 %v1105_v3 }
 0x296   :  { %623 = vmatmul.bf16.gmra.mxu2 %v1106_v29 }
 0x2a6   :  { %628 = vmatmul.bf16.gmra.mxu2 %v1107_v30 }
 0x2b6   :  { %633 = vmatmul.bf16.gmra.mxu2 %v1108_v4 }
 0x2c6   :  { %638 = vmatmul.bf16.gmra.mxu2 %v1109_v31 }
 0x2d6   :  { %643 = vmatmul.bf16.gmra.mxu2 %v1110_v6 }
 0x2e9   :  { %v1450_v32 = vpop.f32.mrf.mxu2 }
 0x2f1   :  { %v1452_v33 = vpop.f32.mrf.mxu2 }
 0x2f9   :  { %v1454_v34 = vpop.f32.mrf.mxu2 }
 0x2fa   :  { %v651_v6 = vmul.f32 0.5, %v1454_v34 }
 0x301   :  { %v1456_v35 = vpop.f32.mrf.mxu2 }
 0x302   :  { %v652_v30 = vmul.f32 0.5, %v1456_v35 }
 0x309   :  { %v1458_v38 = vpop.f32.mrf.mxu2 }
 0x30a   :  { %v653_v3 = vmul.f32 0.5, %v1458_v38 }
 0x311   :  { %v621_v40 = vpop.f32.mrf.mxu2 }
 0x312   :  { %v654_v0 = vmul.f32 0.5, %v621_v40 }
 0x314   :  { %v670_v4 = vmax.f32 %v654_v0, %v621_v40 }
 0x319   :  { %v624_v41 = vpop.f32.mrf.mxu2 }
 0x31a   :  { %v655_v27 = vmul.f32 0.5, %v624_v41 }
 0x31c   :  { %v671_v29 = vmax.f32 %v655_v27, %v624_v41 }
 0x31e   :  { %v1500_v41 = vadd.f32 %v671_v29, %v1416_v22 }
 0x321   :  { %v626_v43 = vpop.f32.mrf.mxu2 }
 0x322   :  { %v656_v57 = vmul.f32 0.5, %v626_v43 }
 0x324   :  { %v672_v28 = vmax.f32 %v656_v57, %v626_v43  ;;  %v668_v43 = vmax.f32 %v652_v30, %v1456_v35 }
 0x326   :  { %v1495_v31 = vadd.f32 %v672_v28, %v1411_v14  ;;  %v649_v14 = vmul.f32 0.5, %v1450_v32 }
 0x328   :  { %v717_v40 = vpack.c.bf16 %v1495_v31, %v1500_v41 }
 0x329   :  { %v629_v45 = vpop.f32.mrf.mxu2 }
 0x32a   :  { %v657_v21 = vmul.f32 0.5, %v629_v45 }
 0x32c   :  { %v673_v18 = vmax.f32 %v657_v21, %v629_v45  ;;  %v686_v45 = vadd.f32 %v670_v4, %v1423_v24 }
 0x331   :  { %v631_v46 = vpop.f32.mrf.mxu2 }
 0x332   :  { %v658_v15 = vmul.f32 0.5, %v631_v46 }
 0x339   :  { %v634_v51 = vpop.f32.mrf.mxu2 }
 0x33a   :  { %v659_v11 = vmul.f32 0.5, %v634_v51 }
 0x33c   :  { %v675_v54 = vmax.f32 %v659_v11, %v634_v51 }
 0x341   :  { %v636_v53 = vpop.f32.mrf.mxu2 }
 0x342   :  { %v660_v8 = vmul.f32 0.5, %v636_v53 }
 0x344   :  { %v676_v49 = vmax.f32 %v660_v8, %v636_v53  ;;  %v684_v53 = vadd.f32 %v668_v43, %v1434_v19  ;;  %v1114_v19 = vld [vmem:[#allocation8 + $0x98] sm:$0xff] }
 0x346   :  { %v1477_v26 = vadd.f32 %v676_v49, %v1393_v1  ;;  %v1489_v1 = vadd.f32 %v673_v18, %v1405_v44  ;;  %v650_v44 = vmul.f32 0.5, %v1452_v33 }
 0x348   :  { %v666_v51 = vmax.f32 %v650_v44, %v1452_v33  ;;  %v1113_v33 = vld [vmem:[#allocation8 + $0x90] sm:$0xff] }
 0x349   :  { %v639_v55 = vpop.f32.mrf.mxu2 }
 0x34a   :  { %v661_v2 = vmul.f32 0.5, %v639_v55  ;;  %v682_v24 = vadd.f32 %v666_v51, %v1443_v62  ;;  %v1118_v62 = vld [vmem:[#allocation8 + $0xb8] sm:$0xff] }
 0x34c   :  { %v677_v12 = vmax.f32 %v661_v2, %v639_v55  ;;  %v665_v55 = vmax.f32 %v649_v14, %v1450_v32  ;;  %v1115_v32 = vld [vmem:[#allocation8 + $0xa0] sm:$0xff] }
 0x34e   :  { %v1472_v25 = vadd.f32 %v677_v12, %v1388_v61 }
 0x351   :  { %v641_v58 = vpop.f32.mrf.mxu2 }
 0x352   :  { %v662_v36 = vmul.f32 0.5, %v641_v58 }
 0x354   :  { %v678_v42 = vmax.f32 %v662_v36, %v641_v58  ;;  %v1116_v36 = vld [vmem:[#allocation8 + $0xa8] sm:$0xff] }
 0x356   :  { %v1469_v23 = vadd.f32 %v678_v42, %v1385_v56  ;;  %v1480_v56 = vadd.f32 %v675_v54, %v1396_v39 }
 0x358   :  { %v719_v61 = vpack.c.bf16 %v1477_v26, %v1480_v56 }
 0x359   :  { %v644_v60 = vpop.f32.mrf.mxu2 }
 0x35a   :  { %v663_v63 = vmul.f32 0.5, %v644_v60 }
 0x35c   :  { %v679_v5 = vmax.f32 %v663_v63, %v644_v60  ;;  %v681_v60 = vadd.f32 %v665_v55, %v1446_v17  ;;  %v1111_v63 = vld [vmem:[#allocation8 + $0x80] sm:$0xff] }
 0x35e   :  { %v1461_v13 = vadd.f32 %v679_v5, %v1377_v48  ;;  %v674_v48 = vmax.f32 %v658_v15, %v631_v46  ;;  %v667_v46 = vmax.f32 %v651_v6, %v1454_v34  ;;  %v714_v34 = vpack.c.bf16 %v682_v24, %v681_v60 }
 0x360   :  { %v1485_v16 = vadd.f32 %v674_v48, %v1401_v9  ;;  %v669_v9 = vmax.f32 %v653_v3, %v1458_v38  ;;  %v683_v35 = vadd.f32 %v667_v46, %v1438_v59  ;;  %v1117_v59 = vld [vmem:[#allocation8 + $0xb0] sm:$0xff] }
 0x361   :  { %v646_v37 = vpop.f32.mrf.mxu2 }
 0x362   :  { %v664_v7 = vmul.f32 0.5, %v646_v37  ;;  %v718_v39 = vpack.c.bf16 %v1485_v16, %v1489_v1  ;;  %v685_v38 = vadd.f32 %v669_v9, %v1428_v20  ;;  %v715_v58 = vpack.c.bf16 %v684_v53, %v683_v35  ;;  %v1112_v20 = vld [vmem:[#allocation8 + $0x88] sm:$0xff] }
 0x364   :  { %v680_v10 = vmax.f32 %v664_v7, %v646_v37  ;;  %v716_v22 = vpack.c.bf16 %v686_v45, %v685_v38 }
 0x366   :  { %v1464_v47 = vadd.f32 %v680_v10, %v1380_v50  ;;  %v720_v50 = vpack.c.bf16 %v1469_v23, %v1472_v25 }
 0x368   :  { %v721_v52 = vpack.c.bf16 %v1464_v47, %v1461_v13 }
 0x36a   :  { %770 = vmatpush.bf16.msra.mxu3 %v721_v52 }
 0x36e   :  { %771 = vmatpush.bf16.msra.mxu3 %v720_v50 }
 0x372   :  { %772 = vmatpush.bf16.msra.mxu3 %v719_v61 }
 0x376   :  { %773 = vmatpush.bf16.msra.mxu3 %v718_v39 }
 0x37a   :  { %774 = vmatpush.bf16.msra.mxu3 %v717_v40 }
 0x37e   :  { %775 = vmatpush.bf16.msra.mxu3 %v716_v22 }
 0x382   :  { %776 = vmatpush.bf16.msra.mxu3 %v715_v58 }
 0x386   :  { %777 = vmatpush.bf16.msra.mxu3 %v714_v34 }
 0x389   :  { %778 = vmatmul.bf16.vlgmr.msra.gmra.mxu3 %v1111_v63 }
 0x399   :  { %783 = vmatmul.bf16.gmra.mxu3 %v1112_v20 }
 0x3a9   :  { %788 = vmatmul.bf16.gmra.mxu3 %v1113_v33 }
 0x3b9   :  { %793 = vmatmul.bf16.gmra.mxu3 %v1114_v19 }
 0x3c9   :  { %798 = vmatmul.bf16.gmra.mxu3 %v1115_v32 }
 0x3d9   :  { %803 = vmatmul.bf16.gmra.mxu3 %v1116_v36 }
 0x3e9   :  { %808 = vmatmul.bf16.gmra.mxu3 %v1117_v59 }
 0x3f9   :  { %813 = vmatmul.bf16.gmra.mxu3 %v1118_v62 }
 0x40c   :  { %v779_v37 = vpop.f32.mrf.mxu3 }
 0x40d   :  { %v819_v17 = vmul.f32 0.5, %v779_v37 }
 0x40f   :  { %v835_v5 = vmax.f32 %v819_v17, %v779_v37 }
 0x411   :  { %v851_v42 = vadd.f32 %v835_v5, %v681_v60 }
 0x414   :  { %v781_v2 = vpop.f32.mrf.mxu3 }
 0x415   :  { %v820_v7 = vmul.f32 0.5, %v781_v2 }
 0x417   :  { %v836_v8 = vmax.f32 %v820_v7, %v781_v2 }
 0x419   :  { %v852_v10 = vadd.f32 %v836_v8, %v682_v24 }
 0x41b   :  { %v1122_v11 = vpack.c.bf16 %v852_v10, %v851_v42 }
 0x41c   :  { %v784_v12 = vpop.f32.mrf.mxu3 }
 0x41d   :  { %1123 = vst [vmem:[#allocation9] sm:$0xff] %v1122_v11   ;;  %v821_v15 = vmul.f32 0.5, %v784_v12 }
 0x41f   :  { %v837_v52 = vmax.f32 %v821_v15, %v784_v12 }
 0x421   :  { %v853_v57 = vadd.f32 %v837_v52, %v683_v35 }
 0x424   :  { %v786_v49 = vpop.f32.mrf.mxu3 }
 0x425   :  { %v822_v21 = vmul.f32 0.5, %v786_v49 }
 0x427   :  { %v838_v54 = vmax.f32 %v822_v21, %v786_v49 }
 0x429   :  { %v854_v48 = vadd.f32 %v838_v54, %v684_v53 }
 0x42b   :  { %v1127_v50 = vpack.c.bf16 %v854_v48, %v853_v57 }
 0x42c   :  { %v789_v27 = vpop.f32.mrf.mxu3 }
 0x42d   :  { %1159 = vst [vmem:[#allocation9 + $0x8] sm:$0xff] %v1127_v50   ;;  %v823_v18 = vmul.f32 0.5, %v789_v27 }
 0x42f   :  { %v839_v28 = vmax.f32 %v823_v18, %v789_v27 }
 0x431   :  { %v855_v29 = vadd.f32 %v839_v28, %v685_v38 }
 0x434   :  { %v791_v0 = vpop.f32.mrf.mxu3 }
 0x435   :  { %v824_v61 = vmul.f32 0.5, %v791_v0 }
 0x437   :  { %v840_v3 = vmax.f32 %v824_v61, %v791_v0 }
 0x439   :  { %v856_v30 = vadd.f32 %v840_v3, %v686_v45 }
 0x43b   :  { %v1132_v4 = vpack.c.bf16 %v856_v30, %v855_v29 }
 0x43c   :  { %v794_v39 = vpop.f32.mrf.mxu3 }
 0x43d   :  { %1160 = vst [vmem:[#allocation9 + $0x10] sm:$0xff] %v1132_v4   ;;  %v825_v6 = vmul.f32 0.5, %v794_v39 }
 0x43f   :  { %v841_v44 = vmax.f32 %v825_v6, %v794_v39 }
 0x441   :  { %v857_v14 = vadd.f32 %v841_v44, %v1500_v41 }
 0x444   :  { %v796_v9 = vpop.f32.mrf.mxu3 }
 0x445   :  { %v826_v43 = vmul.f32 0.5, %v796_v9 }
 0x447   :  { %v842_v40 = vmax.f32 %v826_v43, %v796_v9 }
 0x449   :  { %v858_v46 = vadd.f32 %v842_v40, %v1495_v31 }
 0x44b   :  { %v1137_v51 = vpack.c.bf16 %v858_v46, %v857_v14 }
 0x44c   :  { %v799_v22 = vpop.f32.mrf.mxu3 }
 0x44d   :  { %1161 = vst [vmem:[#allocation9 + $0x18] sm:$0xff] %v1137_v51   ;;  %v827_v53 = vmul.f32 0.5, %v799_v22 }
 0x44f   :  { %v843_v35 = vmax.f32 %v827_v53, %v799_v22 }
 0x451   :  { %v859_v58 = vadd.f32 %v843_v35, %v1489_v1 }
 0x454   :  { %v801_v55 = vpop.f32.mrf.mxu3 }
 0x455   :  { %v828_v38 = vmul.f32 0.5, %v801_v55 }
 0x457   :  { %v844_v45 = vmax.f32 %v828_v38, %v801_v55 }
 0x459   :  { %v860_v24 = vadd.f32 %v844_v45, %v1485_v16 }
 0x45b   :  { %v1142_v60 = vpack.c.bf16 %v860_v24, %v859_v58 }
 0x45c   :  { %v804_v34 = vpop.f32.mrf.mxu3 }
 0x45d   :  { %1162 = vst [vmem:[#allocation9 + $0x20] sm:$0xff] %v1142_v60   ;;  %v829_v63 = vmul.f32 0.5, %v804_v34 }
 0x45f   :  { %v845_v41 = vmax.f32 %v829_v63, %v804_v34 }
 0x461   :  { %v861_v19 = vadd.f32 %v845_v41, %v1480_v56 }
 0x464   :  { %v806_v20 = vpop.f32.mrf.mxu3 }
 0x465   :  { %v830_v33 = vmul.f32 0.5, %v806_v20 }
 0x467   :  { %v846_v31 = vmax.f32 %v830_v33, %v806_v20 }
 0x469   :  { %v862_v32 = vadd.f32 %v846_v31, %v1477_v26 }
 0x46b   :  { %v1147_v36 = vpack.c.bf16 %v862_v32, %v861_v19 }
 0x46c   :  { %v809_v59 = vpop.f32.mrf.mxu3 }
 0x46d   :  { %1163 = vst [vmem:[#allocation9 + $0x28] sm:$0xff] %v1147_v36   ;;  %v831_v62 = vmul.f32 0.5, %v809_v59 }
 0x46f   :  { %v847_v1 = vmax.f32 %v831_v62, %v809_v59 }
 0x471   :  { %v863_v2 = vadd.f32 %v847_v1, %v1472_v25 }
 0x474   :  { %v811_v37 = vpop.f32.mrf.mxu3 }
 0x475   :  { %v832_v17 = vmul.f32 0.5, %v811_v37 }
 0x477   :  { %v848_v16 = vmax.f32 %v832_v17, %v811_v37 }
 0x479   :  { %v864_v5 = vadd.f32 %v848_v16, %v1469_v23 }
 0x47b   :  { %v1152_v7 = vpack.c.bf16 %v864_v5, %v863_v2 }
 0x47c   :  { %v814_v8 = vpop.f32.mrf.mxu3 }
 0x47d   :  { %1164 = vst [vmem:[#allocation9 + $0x30] sm:$0xff] %v1152_v7   ;;  %v833_v42 = vmul.f32 0.5, %v814_v8 }
 0x47f   :  { %v849_v56 = vmax.f32 %v833_v42, %v814_v8 }
 0x481   :  { %v865_v12 = vadd.f32 %v849_v56, %v1461_v13 }
 0x484   :  { %v816_v10 = vpop.f32.mrf.mxu3 }
 0x485   :  { %v834_v11 = vmul.f32 0.5, %v816_v10 }
 0x487   :  { %v850_v26 = vmax.f32 %v834_v11, %v816_v10 }
 0x489   :  { %v866_v25 = vadd.f32 %v850_v26, %v1464_v47 }
 0x48b   :  { %v1157_v15 = vpack.c.bf16 %v866_v25, %v865_v12 }
 0x48d   :  { %1165 = vst [vmem:[#allocation9 + $0x38] sm:$0xff] %v1157_v15  }
 0x48e   :  { %911 = dma.vmem_to_hbm [thread:$0]  %s904_s27, 1024, %s906_s30, [#allocation5], %s1275_s20, %s1275_s20, %s1276_s21  }
 0x48f   :  { %1272 = dma.done.wait [#allocation5], 1024  }
 0x490   :  { %1273 = vsyncadd [#allocation5], 4294966272 }
 0x491   :  { %916 = vsyncpa [#allocation4], 1 }
 0x492   :  { %917 = vsyncpa [#allocation7], 1 }
 0x493   :  { %918 = vsyncpa [#allocation5], 1 }

</bundles_post_ra>
